<compile_context>
chip_gen: v7x
topology: tpu7x:2x2x1
jax: 0.10.0
libtpu: 0.0.40
codegen_flags: <defaults>
</compile_context>

<pallas_src>
import numpy as np

import jax
import jax.numpy as jnp
from jax.experimental import pallas as pl
from jax.experimental.pallas import tpu as pltpu


def _round_up(a, b):
    return (a + b - 1) // b * b


def _length_regulator_kernel(mel_len_ref, bounds_ref, x_ref, out_ref):
    # mel_len_ref : (B,) int32 in SMEM (scalar prefetch) — expanded length per utt
    # bounds_ref  : (1, 2, T_phon) int32 — row 0: start frame, row 1: end frame
    # x_ref       : (1, T_phon, D)
    # out_ref     : (1, TM, D)
    b = pl.program_id(0)
    tm_idx = pl.program_id(1)
    tm = out_ref.shape[1]
    t_phon = x_ref.shape[1]
    tile_start = tm_idx * tm

    valid = tile_start < mel_len_ref[b]

    @pl.when(valid)
    def _():
        # frames[t, i] = global frame index of row t in this tile.
        frames = tile_start + jax.lax.broadcasted_iota(jnp.int32, (tm, t_phon), 0)
        bounds = bounds_ref[...]            # (1, 2, T_phon)
        start = bounds[0, 0:1, :]           # (1, T_phon) — broadcasts over frames
        end = bounds[0, 1:2, :]
        # One-hot expansion matrix: exactly one 1 per valid frame row, all-zero
        # rows for padding frames (t >= mel_len), so padding is exact zeros.
        expand = jnp.logical_and(frames >= start, frames < end).astype(x_ref.dtype)
        out_ref[0] = jnp.dot(expand, x_ref[0],
                             preferred_element_type=jnp.float32).astype(out_ref.dtype)

    @pl.when(jnp.logical_not(valid))
    def _():
        # Entire tile is beyond the expanded length: skip the matmul, write zeros.
        out_ref[...] = jnp.zeros_like(out_ref)


def length_regulator(x, duration, max_mel_len, *, tile_m=256):
    """Pallas implementation of LengthRegulator.forward.

    x          : [B, T_phon, D]   phoneme-level features
    duration   : [B, T_phon]      (possibly fractional) durations
    max_mel_len: static int       padded output length

    Returns (output [B, max_mel_len, D], mel_len [B] int32).
    """
    B, T_phon, D = x.shape
    itemsize = jnp.dtype(x.dtype).itemsize

    # max(round(d), 0) per phoneme, matching torch: int(np.round(d)) clipped at 0.
    dur = jnp.maximum(jnp.round(duration.astype(jnp.float32)), 0.0).astype(jnp.int32)
    end = jnp.cumsum(dur, axis=1)        # end frame (exclusive) of each phoneme
    start = end - dur                    # start frame of each phoneme
    mel_len = end[:, -1]                 # expanded length per utterance (unclamped,
                                         # matching the PyTorch module's mel_len)
    bounds = jnp.stack([start, end], axis=1).astype(jnp.int32)   # (B, 2, T_phon)

    # Lane-dense feature axis: pad D to a multiple of 128 if needed.
    d_pad = _round_up(D, 128)
    if d_pad != D:
        x = jnp.pad(x, ((0, 0), (0, 0), (0, d_pad - D)))

    # Frame tile: multiple of the sublane quantum, capped at tile_m.
    sub = 16 if x.dtype == jnp.bfloat16 else 8
    tm = min(_round_up(tile_m, sub), _round_up(max_mel_len, sub))
    t_mel_pad = _round_up(max_mel_len, tm)
    num_tm = t_mel_pad // tm

    cost = pl.CostEstimate(
        flops=int(2 * B * t_mel_pad * T_phon * d_pad),
        transcendentals=0,
        bytes_accessed=int(B * t_mel_pad * d_pad * itemsize   # output
                           + B * T_phon * d_pad * itemsize    # x
                           + B * 2 * T_phon * 4               # bounds
                           + B * 4),                          # mel_len
    )

    out = pl.pallas_call(
        _length_regulator_kernel,
        out_shape=jax.ShapeDtypeStruct((B, t_mel_pad, d_pad), x.dtype),
        grid_spec=pltpu.PrefetchScalarGridSpec(
            num_scalar_prefetch=1,          # mel_len -> SMEM, gates padding tiles
            grid=(B, num_tm),               # frame-tile axis innermost
            in_specs=[
                # Interval metadata + features: index_maps independent of the
                # frame-tile index -> DMA'd once per utterance, stay resident.
                pl.BlockSpec((1, 2, T_phon), lambda b, t, ml: (b, 0, 0)),
                pl.BlockSpec((1, T_phon, d_pad), lambda b, t, ml: (b, 0, 0)),
            ],
            out_specs=pl.BlockSpec((1, tm, d_pad), lambda b, t, ml: (b, t, 0)),
        ),
        compiler_params=pltpu.CompilerParams(
            dimension_semantics=("parallel", "parallel")),
        cost_estimate=cost,
    )(mel_len, bounds, x)

    if t_mel_pad != max_mel_len or d_pad != D:
        out = out[:, :max_mel_len, :D]
    return out, mel_len


def _reference_numpy(x, duration, max_mel_len):
    """Host-side mirror of the PyTorch LengthRegulator.forward."""
    x = np.asarray(x)
    duration = np.asarray(duration)
    B, T, D = x.shape
    outs, lens = [], []
    for b in range(B):
        rows = []
        for i in range(T):
            r = max(int(np.round(duration[b, i])), 0)
            rows.append(np.repeat(x[b, i:i + 1, :], r, axis=0))
        e = np.concatenate(rows, axis=0) if rows else np.zeros((0, D), x.dtype)
        lens.append(e.shape[0])
        e = np.pad(e, ((0, max_mel_len - e.shape[0]), (0, 0)))
        outs.append(e)
    return np.stack(outs, axis=0), np.array(lens, dtype=np.int64)


if __name__ == "__main__":
    # Small shapes consistent with the module: batch=2, T_phon=8 phonemes,
    # hidden D=128 (lane-dense feature axis), padded mel length 40.
    B, T_phon, D = 2, 8, 128
    max_mel_len = 40

    root = jax.random.PRNGKey(0)
    k_x, k_d = jax.random.split(root)

    x = jax.random.normal(k_x, (B, T_phon, D), dtype=jnp.float32)
    # Integer-valued durations in [0, 4], stored as float (as duration predictors emit).
    duration = jax.random.randint(k_d, (B, T_phon), 0, 5).astype(jnp.float32)

    out, mel_len = length_regulator(x, duration, max_mel_len)
    jax.block_until_ready((out, mel_len))

    out_ref, mel_len_ref = _reference_numpy(x, duration, max_mel_len)

    assert out.shape == (B, max_mel_len, D), out.shape
    assert mel_len.shape == (B,), mel_len.shape
    assert np.array_equal(np.asarray(mel_len), mel_len_ref), (mel_len, mel_len_ref)
    assert np.allclose(np.asarray(out), out_ref, rtol=1e-5, atol=1e-5)

    print("KERNEL_OK")
</pallas_src>

<mosaic_0001>
module attributes {stable_mosaic.version = 11 : i64} {
  func.func @_length_regulator_kernel(%arg0: i32, %arg1: i32, %arg2: memref<2xi32, #tpu.memory_space<smem>>, %arg3: memref<1x2x8xi32, #tpu.memory_space<vmem>>, %arg4: memref<1x8x128xf32, #tpu.memory_space<vmem>>, %arg5: memref<1x40x128xf32, #tpu.memory_space<vmem>>) attributes {dimension_semantics = [#tpu.dimension_semantics<parallel>, #tpu.dimension_semantics<parallel>], iteration_bounds = array<i64: 2, 1>, scalar_prefetch = 1 : i64, scratch_operands = 0 : i64, tpu.core_type = #tpu.core_type<tc>, window_params = [{transform_indices = @transform_0, window_bounds = array<i64: 1, 2, 8>}, {transform_indices = @transform_1, window_bounds = array<i64: 1, 8, 128>}, {transform_indices = @transform_2, window_bounds = array<i64: 1, 40, 128>}]} {
    %c40_i32 = arith.constant 40 : i32
    %0 = arith.muli %arg1, %c40_i32 : i32
    %1 = arith.index_cast %arg0 : i32 to index
    %2 = memref.load %arg2[%1] : memref<2xi32, #tpu.memory_space<smem>>
    %3 = arith.cmpi slt, %0, %2 : i32
    %4 = arith.extui %3 : i1 to i32
    %c0_i32 = arith.constant 0 : i32
    %5 = arith.cmpi ne, %4, %c0_i32 : i32
    scf.if %5 {
      %9 = tpu.iota {dimensions = array<i32: 0>} : vector<40x8xi32>
      %10 = vector.broadcast %0 : i32 to vector<40x8xi32>
      %11 = arith.addi %10, %9 : vector<40x8xi32>
      %c0 = arith.constant 0 : index
      %c0_1 = arith.constant 0 : index
      %c0_2 = arith.constant 0 : index
      %12 = vector.load %arg3[%c0, %c0_1, %c0_2] : memref<1x2x8xi32, #tpu.memory_space<vmem>>, vector<1x2x8xi32>
      %13 = vector.extract_strided_slice %12 {offsets = [0, 0, 0], sizes = [1, 1, 8], strides = [1, 1, 1]} : vector<1x2x8xi32> to vector<1x1x8xi32>
      %14 = vector.shape_cast %13 : vector<1x1x8xi32> to vector<1x8xi32>
      %15 = vector.extract_strided_slice %12 {offsets = [0, 1, 0], sizes = [1, 1, 8], strides = [1, 1, 1]} : vector<1x2x8xi32> to vector<1x1x8xi32>
      %16 = vector.shape_cast %15 : vector<1x1x8xi32> to vector<1x8xi32>
      %17 = vector.broadcast %14 : vector<1x8xi32> to vector<40x8xi32>
      %18 = arith.cmpi sge, %11, %17 : vector<40x8xi32>
      %19 = vector.broadcast %16 : vector<1x8xi32> to vector<40x8xi32>
      %20 = arith.cmpi slt, %11, %19 : vector<40x8xi32>
      %21 = arith.andi %18, %20 : vector<40x8xi1>
      %22 = arith.extui %21 : vector<40x8xi1> to vector<40x8xi32>
      %23 = arith.sitofp %22 : vector<40x8xi32> to vector<40x8xf32>
      %c0_3 = arith.constant 0 : index
      %c0_4 = arith.constant 0 : index
      %c0_5 = arith.constant 0 : index
      %24 = vector.load %arg4[%c0_3, %c0_4, %c0_5] : memref<1x8x128xf32, #tpu.memory_space<vmem>>, vector<1x8x128xf32>
      %25 = vector.shape_cast %24 : vector<1x8x128xf32> to vector<8x128xf32>
      %cst = arith.constant dense<0.000000e+00> : vector<40x128xf32>
      %26 = tpu.matmul %23, %25, %cst {dimension_numbers = #tpu.dot_dimension_numbers<[1], [0], [0], [1], [0, 0, 1, 1], [], []>} : vector<40x8xf32>, vector<8x128xf32>, vector<40x128xf32> -> vector<40x128xf32>
      %c0_6 = arith.constant 0 : index
      %c0_7 = arith.constant 0 : index
      %c0_8 = arith.constant 0 : index
      %27 = vector.load %arg5[%c0_6, %c0_7, %c0_8] : memref<1x40x128xf32, #tpu.memory_space<vmem>>, vector<1x40x128xf32>
      %28 = vector.shape_cast %27 : vector<1x40x128xf32> to vector<40x128xf32>
      %29 = vector.shape_cast %26 : vector<40x128xf32> to vector<1x40x128xf32>
      tpu.vector_store %arg5[%c0_6, %c0_7, %c0_8], %29 {strides = array<i32>} : memref<1x40x128xf32, #tpu.memory_space<vmem>>, vector<1x40x128xf32>,
    } else {
    }
    %true = arith.constant true
    %6 = arith.xori %3, %true : i1
    %7 = arith.extui %6 : i1 to i32
    %c0_i32_0 = arith.constant 0 : i32
    %8 = arith.cmpi ne, %7, %c0_i32_0 : i32
    scf.if %8 {
      %cst = arith.constant 0.000000e+00 : f32
      %9 = vector.broadcast %cst : f32 to vector<1x40x128xf32>
      %c0 = arith.constant 0 : index
      %c0_1 = arith.constant 0 : index
      %c0_2 = arith.constant 0 : index
      %10 = vector.load %arg5[%c0, %c0_1, %c0_2] : memref<1x40x128xf32, #tpu.memory_space<vmem>>, vector<1x40x128xf32>
      tpu.vector_store %arg5[%c0, %c0_1, %c0_2], %9 {strides = array<i32>} : memref<1x40x128xf32, #tpu.memory_space<vmem>>, vector<1x40x128xf32>,
    } else {
    }
    return
  }
  func.func @transform_0(%arg0: i32, %arg1: i32, %arg2: memref<2xi32, #tpu.memory_space<smem>>) -> (i32, i32, i32) {
    %c0_i32 = arith.constant 0 : i32
    %c0_i32_0 = arith.constant 0 : i32
    %c0_i32_1 = arith.constant 0 : i32
    return %arg0, %c0_i32, %c0_i32_0 : i32, i32, i32
  }
  func.func @transform_1(%arg0: i32, %arg1: i32, %arg2: memref<2xi32, #tpu.memory_space<smem>>) -> (i32, i32, i32) {
    %c0_i32 = arith.constant 0 : i32
    %c0_i32_0 = arith.constant 0 : i32
    %c0_i32_1 = arith.constant 0 : i32
    return %arg0, %c0_i32, %c0_i32_0 : i32, i32, i32
  }
  func.func @transform_2(%arg0: i32, %arg1: i32, %arg2: memref<2xi32, #tpu.memory_space<smem>>) -> (i32, i32, i32) {
    %c0_i32 = arith.constant 0 : i32
    %c0_i32_0 = arith.constant 0 : i32
    return %arg0, %arg1, %c0_i32 : i32, i32, i32
  }
}

</mosaic_0001>

<bundles_post_ra>
// kernel: tpu_custom_call.1
= control target key start
LH: loop header
LB: loop body
LE: loop exit
PB: predicated region body
PF: predicated region fallthrough
CT: control target
= control target key end

     0   :  { %s1087_s0 = inlined_call_operand.hbm [shape: s32[2], index: 0, kind: input, shape index: {}]   ;;  %s1088_s1 = inlined_call_operand.hbm [shape: s32[2,2,8], index: 1, kind: input, shape index: {}]   ;;  %s1089_s2 = inlined_call_operand.hbm [shape: f32[2,8,128], index: 2, kind: input, shape index: {}]   ;;  %s1090_s3 = inlined_call_operand.hbm [shape: f32[2,40,128], index: 3, kind: output, shape index: {}]  }
   0x1   :  { %s640_s14 = scalar_lea.hbm %s1087_s0, 16 }
   0x2   :  { %p641_p0 = scmp.ne.s32.totalorder %s1087_s0, %s640_s14  ;;  %p644_p1 = scmp.lt.u32.totalorder %s640_s14, %s1087_s0 }
   0x4   :  { %p646_p2 = pnand %p644_p1, %p641_p0 }
   0x6   :  { %649 = shalt.err (!%p646_p2)  }
   0x7   :  { %s800_s19 = smov [#allocation3]  }
   0x8   :  { %9 = dma.hbm_to_smem %s1087_s0, 16, %s800_s19, [#allocation2] }
   0x9   :  { %762 = dma.done.wait [#allocation2], 16 }
   0xa   :  { %763 = vsyncadd [#allocation2], 4294967280 }
   0xb   :  { %11 = sfence }
   0xc   :  { %12 = vsyncpa [#allocation5], 0 }
   0xd   :  { %14 = vsyncpa [#allocation5 + $0x1], 0 }
   0xe   :  { %15 = vsyncpa [#allocation8], 0 }
   0xf   :  { %17 = vsyncpa [#allocation8 + $0x1], 0 }
  0x10   :  { %18 = vsyncpa [#allocation6], 0 }
  0x11   :  { %20 = vsyncpa [#allocation6 + $0x1], 0  ;;  %s841_s22 = smov 0   ;;  %s843_s23 = smov 0  }
  0x12   :  { %s845_s24 = smov 0   ;;  %s847_s25 = smov 0  }
  0x13   :  { %s849_s26 = smov 0   ;;  %s851_s0 = smov 0  }
  0x14 LB: > { %s512_s27 = sadd.s32 4294967295, %s798_s0   ;;  %s513_s28 = sadd.s32 4294967294, %s798_s0   ;;  %s798_s0 = sphi %s851_s0, %s26_s0   ;;  %s794_s26 = sphi %s849_s26, %s1110_s26   ;;  %s790_s25 = sphi %s847_s25, %s1109_s25   ;;  %s786_s24 = sphi %s845_s24, %s1108_s24   ;;  %s782_s23 = sphi %s843_s23, %s1107_s23   ;;  %s778_s22 = sphi %s841_s22, %s1106_s22  }
  0x15   : > { %s38_s29 = sadd.s32 1, %s794_s26  ;;  %s45_s30 = sadd.s32 1, %s786_s24 }
  0x16   : > { %p40_p3 = scmp.ge.s32.totalorder %s38_s29, 2  ;;  %p52_p4 = scmp.ne.s32.totalorder %s786_s24, %s782_s23 }
  0x17   : > { %p53_p5 = scmp.eq.s32.totalorder %s798_s0, 0  ;;  %p58_p6 = scmp.ne.s32.totalorder %s782_s23, %s778_s22 }
  0x18   : > { %s1112_s29 = smov (%p40_p3, %s38_s29), 0  ;;  %p59_p8 = scmp.eq.s32.totalorder %s512_s27, 0 }
  0x19   : > { %p882_p7 = por %p53_p5, %p52_p4  ;;  %s42_s5 = ssub.s32 %s794_s26, %s1112_s29 }
  0x1a   : > { %p110_p9 = scmp.eq.s32.totalorder %s512_s27, 1  ;;  %p43_p10 = scmp.eq.s32.totalorder %s42_s5, 0 }
  0x1b   : > { %p888_p11 = por %p59_p8, %p58_p6  ;;  %p116_p13 = scmp.eq.s32.totalorder %s513_s28, 1 }
  0x1c   : > { %p892_p12 = por %p110_p9, %p52_p4  ;;  %p584_p2 = scmp.lt.s32.totalorder %s798_s0, 2 }
  0x1d   : > { %s1094_s6 = scalar_select %p888_p11, 1, 0 }
  0x1e   : > { %s1095_s7 = scalar_select %p892_p12, 1, 0 }
  0x1f   : > { %s897_s8 = scalar_select %p43_p10, %s786_s24, %s45_s30  }
  0x20   : > { %p899_p0 = por %p116_p13, %p58_p6  ;;  %s906_s10 = sand.u32 1, %s786_s24  }
  0x21   : > { %s516_s11 = sshll.u32 %s906_s10, 1  ;;  %s517_s12 = sshll.u32 %s794_s26, 5 }
  0x22   : > { %s1096_s9 = scalar_select %p899_p0, 1, 0 }
  0x23   : > { %s913_s15 = scalar_lea.hbm %s1088_s1, %s517_s12  ;;  %s140_s16 = scalar_lea.vmem [#allocation4], %s516_s11 }
  0x24   : > { %s147_s17 = sshll.u32 %s140_s16, 4  ;;  %p919_p3 = pnand %p584_p2, %p882_p7  ;;  %s915_s17 = int_to_ptr.vmem [resolvable:$true] %s147_s17 }
  0x25   : > { %s137_s19 = scalar_lea.sflag [#allocation5], %s906_s10  ;;  %s650_s20 = scalar_lea.hbm %s913_s15, 32 }
  0x26   : > { %p651_p6 = scmp.ne.s32.totalorder %s913_s15, %s650_s20  ;;  %p652_p8 = pneg %p919_p3 }
  0x27   : > { %s655_s28 = scalar_lea.hbm %s1088_s1, 64  ;;  %p656_p7 = scmp.lt.u32.totalorder %s913_s15, %s1088_s1 }
  0x28   : > { %p653_p9 = pnand %p652_p8, %p651_p6  ;;  %p657_p13 = scmp.lt.u32.totalorder %s655_s28, %s650_s20 }
  0x29   : > { %p659_p1 = scmp.lt.u32.totalorder %s650_s20, %s913_s15 }
  0x2a   : > { %p654_p10 = pneg %p653_p9  ;;  %p658_p2 = por %p657_p13, %p656_p7 }
  0x2c   : > { %p660_p4 = por %p659_p1, %p658_p2 }
  0x2e   : > { %p661_p5 = pnand %p660_p4, %p654_p10 }
  0x30   : > { %664 = shalt.err (!%p661_p5)
}
  0x31   : > { %s665_s5 = scalar_lea.vmem %s915_s17, 32  ;;  %s801_s11 = smov [#allocation4]  }
  0x32   : > { %p666_p6 = scmp.ne.s32.totalorder %s915_s17, %s665_s5  ;;  %s670_s12 = sshll.u32 %s801_s11, 4  ;;  %s671_s12 = int_to_ptr.vmem [resolvable:$false] %s670_s12 }
  0x33   : > { %s672_s13 = scalar_lea.vmem %s671_s12, 64  ;;  %p673_p12 = scmp.lt.s32.totalorder %s915_s17, %s671_s12 }
  0x34   : > { %p668_p9 = pnand %p666_p6, %p652_p8  ;;  %p674_p7 = scmp.lt.s32.totalorder %s672_s13, %s665_s5 }
  0x36   : > { %p669_p0 = pneg %p668_p9  ;;  %p675_p13 = por %p674_p7, %p673_p12 }
  0x38   : > { %p676_p1 = pnand %p675_p13, %p669_p0 }
  0x3a   : > { %679 = shalt.err (!%p676_p1)
}
  0x3b   : > { %576 = dma.hbm_to_vmem [thread:$0]  (!%p919_p3), %s913_s15, 32, %s915_s17, %s137_s19  }
  0x3c   : > { %p1098_p4 = scmp.lt.s32.totalorder %s798_s0, 3  ;;  %p1099_p5 = scmp.ge.s32.totalorder %s798_s0, 1 }
  0x3d   : > { %s518_s16 = sshll.u32 %s906_s10, 3  ;;  %s519_s20 = sshll.u32 %s794_s26, 7 }
  0x3e   : > { %p955_p10 = pnand %p1099_p5, %p1098_p4  ;;  %s964_s28 = scalar_lea.hbm %s1089_s2, %s519_s20 }
  0x3f   : > { %s158_s30 = scalar_lea.vmem [#allocation7], %s518_s16  ;;  %s155_s15 = scalar_lea.sflag [#allocation8], %s906_s10 }
  0x40   : > { %s1100_s14 = scalar_select %p955_p10, 1, 0 }
  0x41   : > { %s165_s4 = sshll.u32 %s158_s30, 4  ;;  %s680_s17 = scalar_lea.hbm %s964_s28, 128  ;;  %s166_s4 = int_to_ptr.vmem [resolvable:$true] %s165_s4 }
  0x42   : > { %p681_p12 = scmp.ne.s32.totalorder %s964_s28, %s680_s17  ;;  %s685_s11 = scalar_lea.hbm %s1089_s2, 256 }
  0x43   : > { %p686_p6 = scmp.lt.u32.totalorder %s964_s28, %s1089_s2  ;;  %p687_p9 = scmp.lt.u32.totalorder %s685_s11, %s680_s17 }
  0x44   : > { %p683_p0 = pnand %p681_p12, %p652_p8  ;;  %p689_p13 = scmp.lt.u32.totalorder %s680_s17, %s964_s28 }
  0x45   : > { %p688_p7 = por %p687_p9, %p686_p6 }
  0x46   : > { %p684_p2 = pneg %p683_p0 }
  0x47   : > { %p690_p1 = por %p689_p13, %p688_p7 }
  0x49   : > { %p691_p4 = pnand %p690_p1, %p684_p2 }
  0x4b   : > { %694 = shalt.err (!%p691_p4)
}
  0x4c   : > { %s695_s10 = scalar_lea.vmem %s166_s4, 128  ;;  %s802_s16 = smov [#allocation7]  }
  0x4d   : > { %p696_p5 = scmp.ne.s32.totalorder %s166_s4, %s695_s10  ;;  %s700_s20 = sshll.u32 %s802_s16, 4  ;;  %s701_s20 = int_to_ptr.vmem [resolvable:$false] %s700_s20 }
  0x4e   : > { %s702_s21 = scalar_lea.vmem %s701_s20, 256  ;;  %p703_p11 = scmp.lt.s32.totalorder %s166_s4, %s701_s20 }
  0x4f   : > { %p698_p12 = pnand %p696_p5, %p652_p8  ;;  %p704_p10 = scmp.lt.s32.totalorder %s702_s21, %s695_s10 }
  0x51   : > { %p699_p0 = pneg %p698_p12  ;;  %p705_p6 = por %p704_p10, %p703_p11 }
  0x53   : > { %p706_p9 = pnand %p705_p6, %p699_p0 }
  0x55   : > { %709 = shalt.err (!%p706_p9)
}
  0x56   : > { %579 = dma.hbm_to_vmem [thread:$0]  (!%p919_p3), %s964_s28, 128, %s166_s4, %s155_s15  }
  0x57   : > { %p1101_p2 = scmp.ne.s32.totalorder %s1100_s14, 0 }
  0x58   : > { %s989_s27 = sand.u32 (!%p1101_p2), 1, %s782_s23   ;;  %p1102_p8 = scmp.ne.s32.totalorder (!%p1101_p2), %s1094_s6, 0 }
  0x59   : > { %174 = sbr.rel (%p1101_p2) target bundleno = 374 (0x176), region = 28  ;;  %s521_s30 = sshll.u32 (!%p1101_p2), %s989_s27, 1 }
  0x5a   : > { %s177_s17 = scalar_lea.sflag (!%p1101_p2), [#allocation5], %s989_s27  ;;  %s180_s19 = scalar_lea.vmem (!%p1101_p2), [#allocation4], %s521_s30 }
  0x60   : > { %765 = dma.done.wait (%p1102_p8), %s177_s17, 32  }
  0x61   : > { %767 = vsyncadd (%p1102_p8), %s177_s17, 4294967264  ;;  %s522_s18 = sshll.u32 %s989_s27, 3  ;;  %s186_s14 = scalar_lea.sflag [#allocation8], %s989_s27 }
  0x62   : > { %s189_s28 = scalar_lea.vmem [#allocation7], %s522_s18 }
  0x63   : > { %769 = dma.done.wait (%p1102_p8), %s186_s14, 128  }
  0x64   : > { %771 = vsyncadd (%p1102_p8), %s186_s14, 4294967168  ;;  %s565_s4 = smul.u32 40, %s989_s27  ;;  %s1005_s15 = sld [smem:[#allocation3 + %s790_s25]] }
  0x66   : > { %s1007_s5 = scalar_lea.vmem [#allocation9], %s565_s4 }
  0x6a   : > { %p524_p11 = scmp.le.s32.totalorder %s1005_s15, 0 }
  0x6b   : > { %v268_v0 = vld [vmem:[%s189_s28] sm:$0xff] (!%p524_p11)  ;;  %v222_v1 = vlaneseq (!%p524_p11)  ;;  %v803_v2 = vmov (!%p524_p11), 0.0   ;;  %vm804_vm0 = vmmov (!%p524_p11), 0   ;;  %v234_v4 = vld [vmem:[%s180_s19] sm:$0x3] (!%p524_p11)  ;;  %vm269_vm1 = vcmask (!%p524_p11), 64512  }
  0x6c   : > { %221 = sbr.rel (%p524_p11) target bundleno = 339 (0x153), region = 40  ;;  %546 = vmatprep.subr.mxu0 (!%p524_p11), %v803_v2  ;;  %548 = vmatprep.mubr.msk.f32.mxu0 (!%p524_p11), %vm804_vm0, %v803_v2 }
  0x6d   : > { %547 = vmatpush3.msra.mxu0 (!%p524_p11), %v268_v0  ;;  %v223_v3 = vshrl.u32 (!%p524_p11), %v222_v1, 7  ;;  %563 = vmatprep.subr.mxu1 (!%p524_p11), %v803_v2 }
  0x6e   : > { %564 = vmatpush3.msra.mxu1 (!%p524_p11), %v268_v0  ;;  %557 = vmatprep.mubr.msk.f32.mxu1 (!%p524_p11), %vm804_vm0, %v803_v2 }
  0x6f   : > { %v237_v5 = vsub.s32 (!%p524_p11), 0, %v223_v3  ;;  %v246_v6 = vsub.s32 (!%p524_p11), 1, %v223_v3  ;;  %v226_v7 = vadd.s32 (!%p524_p11), 24, %v223_v3  ;;  %v224_v8 = vadd.s32 (!%p524_p11), 8, %v223_v3 }
  0x70   : > { %v227_v9 = vadd.s32 (!%p524_p11), 32, %v223_v3  ;;  %v225_v12 = vadd.s32 (!%p524_p11), 16, %v223_v3 }
  0x71   : > { %v238_v10 = vrot.slane (!%p524_p11), %v234_v4, %v237_v5  ;;  %v247_v11 = vrot.slane (!%p524_p11), %v234_v4, %v246_v6 }
  0x73   : > { %vm239_vm2 = vcmp.ge.s32.totalorder %v223_v3, %v238_v10  ;;  %vm248_vm3 = vcmp.lt.s32.totalorder %v223_v3, %v247_v11  ;;  %vm242_vm4 = vcmp.ge.s32.totalorder %v226_v7, %v238_v10  ;;  %vm251_vm5 = vcmp.lt.s32.totalorder %v226_v7, %v247_v11 }
  0x74   : > { %vm253_vm6 = vmand %vm239_vm2, %vm248_vm3  ;;  %vm240_vm7 = vcmp.ge.s32.totalorder %v224_v8, %v238_v10  ;;  %vm249_vm8 = vcmp.lt.s32.totalorder %v224_v8, %v247_v11  ;;  %vm243_vm9 = vcmp.ge.s32.totalorder %v227_v9, %v238_v10  ;;  %vm252_vm10 = vcmp.lt.s32.totalorder %v227_v9, %v247_v11 }
  0x75   : > { %v525_v13 = vsel %vm253_vm6, 1.0, %v803_v2  ;;  %vm256_vm11 = vmand %vm242_vm4, %vm251_vm5  ;;  %vm241_vm12 = vcmp.ge.s32.totalorder %v225_v12, %v238_v10  ;;  %vm250_vm13 = vcmp.lt.s32.totalorder %v225_v12, %v247_v11 }
  0x76   : > { %549 = vmatmul.mubr.msk.f32.vlgmr.msra.gmra.mrb[0].mxu0 %vm269_vm1, %v525_v13  ;;  %v528_v14 = vsel %vm256_vm11, 1.0, %v803_v2  ;;  %vm254_vm14 = vmand %vm240_vm7, %vm249_vm8 }
  0x77   : > { %551 = vmatprep.mubr.msk.f32.mxu0 %vm804_vm0, %v803_v2  ;;  %558 = vmatmul.mubr.msk.f32.vlgmr.msra.gmra.mrb[0].mxu1 %vm269_vm1, %v528_v14  ;;  %v526_v15 = vsel %vm254_vm14, 1.0, %v803_v2  ;;  %vm257_vm15 = vmand %vm243_vm9, %vm252_vm10 }
  0x78   : > { %560 = vmatprep.mubr.msk.f32.mxu1 %vm804_vm0, %v803_v2  ;;  %v529_v16 = vsel %vm257_vm15, 1.0, %v803_v2  ;;  %vm255_vm2 = vmand %vm241_vm12, %vm250_vm13 }
  0x79   : > { %v527_v17 = vsel %vm255_vm2, 1.0, %v803_v2 }
  0x7a   : > { %552 = vmatmul.mubr.msk.f32.gmra.mrb[2].mxu0 %vm269_vm1, %v526_v15 }
  0x7b   : > { %554 = vmatprep.mubr.msk.f32.mxu0 %vm804_vm0, %v803_v2  ;;  %561 = vmatmul.mubr.msk.f32.gmra.mrb[2].mxu1 %vm269_vm1, %v529_v16 }
  0x7e   : > { %555 = vmatmul.mubr.msk.f32.gmra.mrb[4].mxu0 %vm269_vm1, %v527_v17 }
 0x149   : > { %v351_v18 = vpop.f32.mrb[0].mxu0 }
 0x14a   : > { %375 = vst [vmem:[%s1007_s5] sm:$0xff] %v351_v18  ;;  %v550_v19 = vpop.f32.mrb[1].mxu0  ;;  %v366_v20 = vpop.f32.mrb[0].mxu1 }
 0x14b   : > { %378 = vst [vmem:[%s1007_s5 + $0x18] sm:$0xff] %v366_v20  ;;  %v559_v21 = vpop.f32.mrb[1].mxu1 }
 0x14d   : > { %v356_v22 = vpop.f32.mrb[2].mxu0 }
 0x14e   : > { %376 = vst [vmem:[%s1007_s5 + $0x8] sm:$0xff] %v356_v22  ;;  %v553_v23 = vpop.f32.mrb[3].mxu0  ;;  %v371_v24 = vpop.f32.mrb[2].mxu1 }
 0x14f   : > { %379 = vst [vmem:[%s1007_s5 + $0x20] sm:$0xff] %v371_v24  ;;  %v562_v25 = vpop.f32.mrb[3].mxu1 }
 0x151   : > { %v361_v26 = vpop.f32.mrb[4].mxu0 }
 0x152   : > { %377 = vst [vmem:[%s1007_s5 + $0x10] sm:$0xff] %v361_v26  ;;  %v556_v27 = vpop.f32.mrb[5].mxu0 }
 0x153 PF: > { %p536_p3 = scmp.gt.s32.totalorder %s1005_s15, 0 }
 0x154   : > { %v805_v28 = vmov (!%p536_p3), 0.0  }
 0x155   : > { %383 = sbr.rel (%p536_p3) target bundleno = 348 (0x15c), region = 44  ;;  %384 = vst [vmem:[%s1007_s5] sm:$0xff] (!%p536_p3), %v805_v28  ;;  %385 = vst [vmem:[%s1007_s5 + $0x8] sm:$0xff] (!%p536_p3), %v805_v28 }
 0x156   : > { %386 = vst [vmem:[%s1007_s5 + $0x10] sm:$0xff] (!%p536_p3), %v805_v28  ;;  %387 = vst [vmem:[%s1007_s5 + $0x18] sm:$0xff] (!%p536_p3), %v805_v28 }
 0x157   : > { %388 = vst [vmem:[%s1007_s5 + $0x20] sm:$0xff] (!%p536_p3), %v805_v28 }
 0x15c PF: > { %s566_s6 = smul.u32 640, %s790_s25  ;;  %s405_s11 = sshll.u32 %s1007_s5, 4  ;;  %s1038_s11 = int_to_ptr.vmem [resolvable:$true] %s405_s11 }
 0x15d   : > { %s390_s16 = scalar_lea.sflag [#allocation6], %s989_s27  ;;  %s710_s20 = scalar_lea.vmem %s1038_s11, 640 }
 0x15e   : > { %s1036_s10 = scalar_lea.hbm %s1090_s3, %s566_s6  ;;  %p711_p10 = scmp.ne.s32.totalorder %s1038_s11, %s710_s20 }
 0x15f   : > { %p1103_p7 = scmp.ne.s32.totalorder %s1095_s7, 0  ;;  %s806_s21 = smov [#allocation9]  }
 0x160   : > { %s714_s30 = sshll.u32 %s806_s21, 4  ;;  %s715_s30 = int_to_ptr.vmem [resolvable:$false] %s714_s30 }
 0x161   : > { %p712_p13 = pnand %p711_p10, %p1103_p7  ;;  %s716_s25 = scalar_lea.vmem %s715_s30, 1280 }
 0x162   : > { %p717_p4 = scmp.lt.s32.totalorder %s1038_s11, %s715_s30  ;;  %p718_p5 = scmp.lt.s32.totalorder %s716_s25, %s710_s20 }
 0x163   : > { %p713_p1 = pneg %p712_p13 }
 0x164   : > { %p719_p12 = por %p718_p5, %p717_p4 }
 0x166   : > { %p720_p0 = pnand %p719_p12, %p713_p1 }
 0x168   : > { %723 = shalt.err (!%p720_p0)
}
 0x169   : > { %s724_s17 = scalar_lea.hbm %s1036_s10, 640  ;;  %s728_s14 = scalar_lea.hbm %s1090_s3, 1280 }
 0x16a   : > { %p725_p6 = scmp.ne.s32.totalorder %s1036_s10, %s724_s17  ;;  %p729_p8 = scmp.lt.u32.totalorder %s1036_s10, %s1090_s3 }
 0x16b   : > { %p730_p11 = scmp.lt.u32.totalorder %s728_s14, %s724_s17  ;;  %p732_p10 = scmp.lt.u32.totalorder %s724_s17, %s1036_s10 }
 0x16c   : > { %p726_p9 = pnand %p725_p6, %p1103_p7 }
 0x16d   : > { %p731_p3 = por %p730_p11, %p729_p8 }
 0x16e   : > { %p727_p2 = pneg %p726_p9 }
 0x16f   : > { %p733_p13 = por %p732_p10, %p731_p3 }
 0x171   : > { %p734_p1 = pnand %p733_p13, %p727_p2 }
 0x173   : > { %737 = shalt.err (!%p734_p1)
}
 0x174   : > { %s807_s15 = smov 128   ;;  %s808_s5 = smov 8  }
 0x175   : > { %571 = dma.vmem_to_hbm [thread:$0]  (%p1103_p7), %s1038_s11, 640, %s1036_s10, %s390_s16, %s807_s15, %s807_s15, %s808_s5  }
 0x176 PF: > { %s420_s6 = sand.u32 1, %s778_s22   ;;  %p1104_p4 = scmp.ne.s32.totalorder %s1096_s9, 0 }
 0x177   : > { %p1105_p5 = scmp.ge.s32.totalorder %s798_s0, 2  ;;  %s421_s12 = scalar_lea.sflag [#allocation6], %s420_s6 }
 0x179   : > { %p581_p12 = pnand %p1105_p5, %p1104_p4 }
 0x17b   : > { %773 = dma.done.wait (!%p581_p12), %s421_s12, 640  }
 0x17c   : > { %775 = vsyncadd (!%p581_p12), %s421_s12, 4294966656  ;;  %s26_s0 = sadd.s32 1, %s798_s0   ;;  %s1106_s22 = smov %s782_s23 }
 0x17d   : > { %p23_p0 = scmp.ge.s32.totalorder %s26_s0, 4   ;;  %s1107_s23 = smov %s786_s24 }
 0x17e   : > { %s1108_s24 = smov %s897_s8  ;;  %s1109_s25 = smov %s794_s26 }
 0x17f   : > { %s1110_s26 = smov %s1112_s29  ;;  %25 = sbr.rel (!%p23_p0) target bundleno = 20 (0x14), region = 94 }
 0x186   :  { %426 = vsyncpa [#allocation5], 1 }
 0x187   :  { %428 = vsyncpa [#allocation5 + $0x1], 1 }
 0x188   :  { %429 = vsyncpa [#allocation8], 1 }
 0x189   :  { %431 = vsyncpa [#allocation8 + $0x1], 1 }
 0x18a   :  { %432 = vsyncpa [#allocation6], 1 }
 0x18b   :  { %434 = vsyncpa [#allocation6 + $0x1], 1 }

</bundles_post_ra>
